<compile_context>
chip_gen: v7x
topology: tpu7x:2x2x1
jax: 0.10.0
libtpu: 0.0.40
codegen_flags: <defaults>
</compile_context>

<pallas_src>
import jax
import jax.numpy as jnp
from jax.experimental import pallas as pl
from jax.experimental.pallas import tpu as pltpu


def _make_channel_attention_kernel(hw_total, tile_s, chunk, needs_mask):
    n_chunks = tile_s // chunk

    def kernel(x_ref, w1_ref, w2_ref, out_ref, sum_acc, max_acc):
        # x_ref:  (TILE_N, C, TILE_S)  spatial tile of flattened NCHW input
        # w1_ref: (C_r, C)             first 1x1 conv weight (squeezed)
        # w2_ref: (C, C_r)             second 1x1 conv weight (squeezed)
        # out_ref:(TILE_N, C)          sigmoid(channel attention logits)
        s_id = pl.program_id(1)

        @pl.when(s_id == 0)
        def _init():
            sum_acc[...] = jnp.zeros_like(sum_acc)
            max_acc[...] = jnp.full_like(max_acc, -jnp.inf)

        # Per-chunk accumulation: native-dtype load, upcast per chunk into
        # f32 accumulators.  Pure VPU (vadd/vmax) per grid step.
        for j in range(n_chunks):
            cx = x_ref[:, :, pl.ds(j * chunk, chunk)].astype(jnp.float32)
            if needs_mask:
                pos = (s_id * tile_s + j * chunk
                       + jax.lax.broadcasted_iota(jnp.int32, cx.shape, 2))
                valid = pos < hw_total
                c_sum = jnp.where(valid, cx, 0.0)
                c_max = jnp.where(valid, cx, -jnp.inf)
            else:
                c_sum = cx
                c_max = cx
            sum_acc[...] += c_sum
            max_acc[...] = jnp.maximum(max_acc[...], c_max)

        @pl.when(s_id == pl.num_programs(1) - 1)
        def _finalize():
            tile_n = out_ref.shape[0]
            # Single cross-lane reduce each (XLU), only at the end.
            avg = jnp.sum(sum_acc[...], axis=-1) * (1.0 / hw_total)   # (TILE_N, C)
            mx = jnp.max(max_acc[...], axis=-1)                       # (TILE_N, C)

            # Shared MLP, run once on stacked [avg; max] -> half the MXU work.
            stacked = jnp.concatenate([avg, mx], axis=0)              # (2*TILE_N, C)
            w1 = w1_ref[...].astype(jnp.float32)                      # (C_r, C)
            w2 = w2_ref[...].astype(jnp.float32)                      # (C, C_r)
            h = jax.lax.dot_general(
                stacked, w1, (((1,), (1,)), ((), ())),
                preferred_element_type=jnp.float32)                   # (2*TILE_N, C_r)
            h = jnp.maximum(h, 0.0)                                   # ReLU
            logits2 = jax.lax.dot_general(
                h, w2, (((1,), (1,)), ((), ())),
                preferred_element_type=jnp.float32)                   # (2*TILE_N, C)
            logits = logits2[:tile_n] + logits2[tile_n:]
            out_ref[...] = jax.nn.sigmoid(logits).astype(out_ref.dtype)

    return kernel


def channel_attention(x_nchw, w1, w2, *, tile_n=None, tile_s=None,
                      target_tile_bytes=4 * 1024 * 1024):
    """x_nchw: (N, C, H, W); w1: (C_r, C); w2: (C, C_r) -> (N, C, 1, 1)."""
    N, C, H, W = x_nchw.shape
    HW = H * W
    x_flat = x_nchw.reshape(N, C, HW)

    # --- Tile sizing: keep the double-buffered x tile well under scoped VMEM
    #     on every generation (v5e 16 MiB default, v7x 64 MiB physical). ----
    if tile_n is None:
        tile_n = N if N <= 8 else 8
    if tile_s is None:
        if HW <= 128:
            tile_s = HW
        else:
            elem_bytes = x_flat.dtype.itemsize
            max_s = max(128,
                        (target_tile_bytes // (tile_n * C * elem_bytes))
                        // 128 * 128)
            tile_s = min(max_s, (HW // 128) * 128)

    if tile_s % 512 == 0:
        chunk = 512
    elif tile_s % 128 == 0:
        chunk = 128
    else:
        chunk = tile_s
    needs_mask = (HW % tile_s) != 0

    grid = (pl.cdiv(N, tile_n), pl.cdiv(HW, tile_s))
    kernel = _make_channel_attention_kernel(HW, tile_s, chunk, needs_mask)

    out = pl.pallas_call(
        kernel,
        out_shape=jax.ShapeDtypeStruct((N, C), x_nchw.dtype),
        grid=grid,
        in_specs=[
            pl.BlockSpec((tile_n, C, tile_s), lambda n, s: (n, 0, s)),
            # Tiny weights: constant block index -> fetched once, not per step.
            pl.BlockSpec(w1.shape, lambda n, s: (0, 0)),
            pl.BlockSpec(w2.shape, lambda n, s: (0, 0)),
        ],
        # Output resident across the spatial (reduction) axis: maps on N only.
        out_specs=pl.BlockSpec((tile_n, C), lambda n, s: (n, 0)),
        scratch_shapes=[
            pltpu.VMEM((tile_n, C, chunk), jnp.float32),   # running sum
            pltpu.VMEM((tile_n, C, chunk), jnp.float32),   # running max
        ],
        compiler_params=pltpu.CompilerParams(
            dimension_semantics=("parallel", "arbitrary"),
            vmem_limit_bytes=32 * 1024 * 1024,
        ),
    )(x_flat, w1, w2)

    return out.reshape(N, C, 1, 1)


def reference_channel_attention(x_nchw, w1, w2):
    """Pure-JAX reference matching the PyTorch forward."""
    avg = jnp.mean(x_nchw, axis=(2, 3))                       # (N, C)
    mx = jnp.max(x_nchw, axis=(2, 3))                         # (N, C)

    def mlp(v):
        h = jnp.maximum(v @ w1.T, 0.0)
        return h @ w2.T

    return jax.nn.sigmoid(mlp(avg) + mlp(mx))[:, :, None, None]


if __name__ == "__main__":
    # Module config: in_channels=32, reduction_ratio=16 -> hidden = 2
    N, C, H, W = 2, 32, 16, 16
    reduction_ratio = 16
    C_r = C // reduction_ratio

    key = jax.random.PRNGKey(0)
    kx, k1, k2 = jax.random.split(key, 3)

    x = jax.random.normal(kx, (N, C, H, W), dtype=jnp.float32)
    # Conv2d weights: (out_ch, in_ch, 1, 1) squeezed to 2D (deterministic init).
    w1 = (jax.random.normal(k1, (C_r, C, 1, 1), dtype=jnp.float32) * 0.1
          ).reshape(C_r, C)
    w2 = (jax.random.normal(k2, (C, C_r, 1, 1), dtype=jnp.float32) * 0.1
          ).reshape(C, C_r)

    # tile_s=128 forces a 2-step spatial reduction so the accumulator
    # init / accumulate / finalize path is exercised at this tiny demo size.
    out = channel_attention(x, w1, w2, tile_s=128)
    out = jax.block_until_ready(out)

    ref = reference_channel_attention(x, w1, w2)
    assert out.shape == (N, C, 1, 1), out.shape
    assert jnp.allclose(out, ref, atol=1e-5, rtol=1e-5), (
        float(jnp.max(jnp.abs(out - ref))))

    print("KERNEL_OK")
</pallas_src>

<mosaic_0001>
module attributes {stable_mosaic.version = 11 : i64} {
  func.func @kernel(%arg0: i32, %arg1: i32, %arg2: memref<2x32x128xf32, #tpu.memory_space<vmem>>, %arg3: memref<2x32xf32, #tpu.memory_space<vmem>>, %arg4: memref<32x2xf32, #tpu.memory_space<vmem>>, %arg5: memref<2x32xf32, #tpu.memory_space<vmem>>, %arg6: memref<2x32x128xf32, #tpu.memory_space<vmem>>, %arg7: memref<2x32x128xf32, #tpu.memory_space<vmem>>) attributes {dimension_semantics = [#tpu.dimension_semantics<parallel>, #tpu.dimension_semantics<arbitrary>], iteration_bounds = array<i64: 1, 2>, scalar_prefetch = 0 : i64, scratch_operands = 2 : i64, tpu.core_type = #tpu.core_type<tc>, window_params = [{transform_indices = @transform_0, window_bounds = array<i64: 2, 32, 128>}, {pipeline_mode = #tpu.pipeline_mode<synchronous>, transform_indices = @transform_1, window_bounds = array<i64: 2, 32>}, {pipeline_mode = #tpu.pipeline_mode<synchronous>, transform_indices = @transform_2, window_bounds = array<i64: 32, 2>}, {transform_indices = @transform_3, window_bounds = array<i64: 2, 32>}]} {
    %c0_i32 = arith.constant 0 : i32
    %0 = arith.cmpi eq, %arg1, %c0_i32 : i32
    %1 = arith.extui %0 : i1 to i32
    %c0_i32_0 = arith.constant 0 : i32
    %2 = arith.cmpi ne, %1, %c0_i32_0 : i32
    scf.if %2 {
      %cst = arith.constant 0.000000e+00 : f32
      %13 = vector.broadcast %cst : f32 to vector<2x32x128xf32>
      %c0_16 = arith.constant 0 : index
      %c0_17 = arith.constant 0 : index
      %c0_18 = arith.constant 0 : index
      %14 = vector.load %arg6[%c0_16, %c0_17, %c0_18] : memref<2x32x128xf32, #tpu.memory_space<vmem>>, vector<2x32x128xf32>
      tpu.vector_store %arg6[%c0_16, %c0_17, %c0_18], %13 {strides = array<i32>} : memref<2x32x128xf32, #tpu.memory_space<vmem>>, vector<2x32x128xf32>,
      %cst_19 = arith.constant 0xFF800000 : f32
      %15 = vector.broadcast %cst_19 : f32 to vector<2x32x128xf32>
      %c0_20 = arith.constant 0 : index
      %c0_21 = arith.constant 0 : index
      %c0_22 = arith.constant 0 : index
      %16 = vector.load %arg7[%c0_20, %c0_21, %c0_22] : memref<2x32x128xf32, #tpu.memory_space<vmem>>, vector<2x32x128xf32>
      tpu.vector_store %arg7[%c0_20, %c0_21, %c0_22], %15 {strides = array<i32>} : memref<2x32x128xf32, #tpu.memory_space<vmem>>, vector<2x32x128xf32>,
    } else {
    }
    %c0 = arith.constant 0 : index
    %c0_1 = arith.constant 0 : index
    %c0_2 = arith.constant 0 : index
    %3 = vector.load %arg2[%c0, %c0_1, %c0_2] : memref<2x32x128xf32, #tpu.memory_space<vmem>>, vector<2x32x128xf32>
    %c0_3 = arith.constant 0 : index
    %c0_4 = arith.constant 0 : index
    %c0_5 = arith.constant 0 : index
    %4 = vector.load %arg6[%c0_3, %c0_4, %c0_5] : memref<2x32x128xf32, #tpu.memory_space<vmem>>, vector<2x32x128xf32>
    %5 = arith.addf %4, %3 : vector<2x32x128xf32>
    %c0_6 = arith.constant 0 : index
    %c0_7 = arith.constant 0 : index
    %c0_8 = arith.constant 0 : index
    %6 = vector.load %arg6[%c0_6, %c0_7, %c0_8] : memref<2x32x128xf32, #tpu.memory_space<vmem>>, vector<2x32x128xf32>
    tpu.vector_store %arg6[%c0_6, %c0_7, %c0_8], %5 {strides = array<i32>} : memref<2x32x128xf32, #tpu.memory_space<vmem>>, vector<2x32x128xf32>,
    %c0_9 = arith.constant 0 : index
    %c0_10 = arith.constant 0 : index
    %c0_11 = arith.constant 0 : index
    %7 = vector.load %arg7[%c0_9, %c0_10, %c0_11] : memref<2x32x128xf32, #tpu.memory_space<vmem>>, vector<2x32x128xf32>
    %8 = arith.maximumf %7, %3 : vector<2x32x128xf32>
    %c0_12 = arith.constant 0 : index
    %c0_13 = arith.constant 0 : index
    %c0_14 = arith.constant 0 : index
    %9 = vector.load %arg7[%c0_12, %c0_13, %c0_14] : memref<2x32x128xf32, #tpu.memory_space<vmem>>, vector<2x32x128xf32>
    tpu.vector_store %arg7[%c0_12, %c0_13, %c0_14], %8 {strides = array<i32>} : memref<2x32x128xf32, #tpu.memory_space<vmem>>, vector<2x32x128xf32>,
    %c1_i32 = arith.constant 1 : i32
    %10 = arith.cmpi eq, %arg1, %c1_i32 : i32
    %11 = arith.extui %10 : i1 to i32
    %c0_i32_15 = arith.constant 0 : i32
    %12 = arith.cmpi ne, %11, %c0_i32_15 : i32
    scf.if %12 {
      %c0_16 = arith.constant 0 : index
      %c0_17 = arith.constant 0 : index
      %c0_18 = arith.constant 0 : index
      %13 = vector.load %arg6[%c0_16, %c0_17, %c0_18] : memref<2x32x128xf32, #tpu.memory_space<vmem>>, vector<2x32x128xf32>
      %cst = arith.constant dense<0.000000e+00> : vector<2x32xf32>
      %14 = vector.multi_reduction <add>, %13, %cst [2] : vector<2x32x128xf32> to vector<2x32xf32>
      %cst_19 = arith.constant 3.906250e-03 : f32
      %15 = vector.broadcast %cst_19 : f32 to vector<2x32xf32>
      %16 = arith.mulf %14, %15 : vector<2x32xf32>
      %c0_20 = arith.constant 0 : index
      %c0_21 = arith.constant 0 : index
      %c0_22 = arith.constant 0 : index
      %17 = vector.load %arg7[%c0_20, %c0_21, %c0_22] : memref<2x32x128xf32, #tpu.memory_space<vmem>>, vector<2x32x128xf32>
      %cst_23 = arith.constant dense<0xFF800000> : vector<2x32xf32>
      %18 = vector.multi_reduction <maximumf>, %17, %cst_23 [2] : vector<2x32x128xf32> to vector<2x32xf32>
      %19 = tpu.concatenate %16, %18 in 0 : vector<2x32xf32>, vector<2x32xf32> -> vector<4x32xf32>
      %c0_24 = arith.constant 0 : index
      %c0_25 = arith.constant 0 : index
      %20 = vector.load %arg3[%c0_24, %c0_25] : memref<2x32xf32, #tpu.memory_space<vmem>>, vector<2x32xf32>
      %c0_26 = arith.constant 0 : index
      %c0_27 = arith.constant 0 : index
      %21 = vector.load %arg4[%c0_26, %c0_27] : memref<32x2xf32, #tpu.memory_space<vmem>>, vector<32x2xf32>
      %cst_28 = arith.constant dense<0.000000e+00> : vector<4x2xf32>
      %22 = tpu.matmul %19, %20, %cst_28 {dimension_numbers = #tpu.dot_dimension_numbers<[1], [1], [0], [0], [0, 0, 1, 0], [], []>} : vector<4x32xf32>, vector<2x32xf32>, vector<4x2xf32> -> vector<4x2xf32>
      %cst_29 = arith.constant 0.000000e+00 : f32
      %23 = vector.broadcast %cst_29 : f32 to vector<4x2xf32>
      %24 = arith.maximumf %22, %23 : vector<4x2xf32>
      %cst_30 = arith.constant dense<0.000000e+00> : vector<4x32xf32>
      %25 = tpu.matmul %24, %21, %cst_30 {dimension_numbers = #tpu.dot_dimension_numbers<[1], [1], [0], [0], [0, 0, 1, 0], [], []>} : vector<4x2xf32>, vector<32x2xf32>, vector<4x32xf32> -> vector<4x32xf32>
      %26 = vector.extract_strided_slice %25 {offsets = [0, 0], sizes = [2, 32], strides = [1, 1]} : vector<4x32xf32> to vector<2x32xf32>
      %27 = vector.extract_strided_slice %25 {offsets = [2, 0], sizes = [2, 32], strides = [1, 1]} : vector<4x32xf32> to vector<2x32xf32>
      %28 = arith.addf %26, %27 : vector<2x32xf32>
      %29 = arith.negf %28 : vector<2x32xf32>
      %30 = math.exp %29 : vector<2x32xf32>
      %cst_31 = arith.constant 1.000000e+00 : f32
      %31 = vector.broadcast %cst_31 : f32 to vector<2x32xf32>
      %32 = arith.addf %31, %30 : vector<2x32xf32>
      %33 = arith.divf %31, %32 : vector<2x32xf32>
      %c0_32 = arith.constant 0 : index
      %c0_33 = arith.constant 0 : index
      %34 = vector.load %arg5[%c0_32, %c0_33] : memref<2x32xf32, #tpu.memory_space<vmem>>, vector<2x32xf32>
      tpu.vector_store %arg5[%c0_32, %c0_33], %33 {strides = array<i32>} : memref<2x32xf32, #tpu.memory_space<vmem>>, vector<2x32xf32>,
    } else {
    }
    return
  }
  func.func @transform_0(%arg0: i32, %arg1: i32) -> (i32, i32, i32) {
    %c0_i32 = arith.constant 0 : i32
    %c0_i32_0 = arith.constant 0 : i32
    return %arg0, %c0_i32, %arg1 : i32, i32, i32
  }
  func.func @transform_1(%arg0: i32, %arg1: i32) -> (i32, i32) {
    %c0_i32 = arith.constant 0 : i32
    %c0_i32_0 = arith.constant 0 : i32
    %c0_i32_1 = arith.constant 0 : i32
    return %c0_i32, %c0_i32_0 : i32, i32
  }
  func.func @transform_2(%arg0: i32, %arg1: i32) -> (i32, i32) {
    %c0_i32 = arith.constant 0 : i32
    %c0_i32_0 = arith.constant 0 : i32
    %c0_i32_1 = arith.constant 0 : i32
    return %c0_i32, %c0_i32_0 : i32, i32
  }
  func.func @transform_3(%arg0: i32, %arg1: i32) -> (i32, i32) {
    %c0_i32 = arith.constant 0 : i32
    %c0_i32_0 = arith.constant 0 : i32
    return %arg0, %c0_i32 : i32, i32
  }
}

</mosaic_0001>

<bundles_post_ra>
// kernel: tpu_custom_call.1
= control target key start
LH: loop header
LB: loop body
LE: loop exit
PB: predicated region body
PF: predicated region fallthrough
CT: control target
= control target key end

     0   :  { %8 = vsyncpa [#allocation5], 0  ;;  %s1159_s0 = inlined_call_operand.hbm [shape: f32[2,32,256], index: 0, kind: input, shape index: {}]   ;;  %s1160_s1 = inlined_call_operand.vmem [shape: f32[2,32], index: 1, kind: input, shape index: {}]   ;;  %s1161_s2 = inlined_call_operand.vmem [shape: f32[32,2], index: 2, kind: input, shape index: {}]   ;;  %s1162_s3 = inlined_call_operand.hbm [shape: f32[2,32], index: 3, kind: output, shape index: {}]  }
   0x1   :  { %10 = vsyncpa [#allocation5 + $0x1], 0 }
   0x2   :  { %11 = vsyncpa [#allocation6], 0  ;;  %s964_s12 = smov 0   ;;  %s966_s13 = smov 0  }
   0x3   :  { %s968_s14 = smov 0   ;;  %s970_s15 = smov 0  }
   0x4   :  { %s972_s16 = smov 0   ;;  %s974_s17 = smov 0  }
   0x5 LB: > { %s696_s18 = sadd.s32 4294967295, %s932_s17   ;;  %s26_s19 = sadd.s32 1, %s928_s16  ;;  %s932_s17 = sphi %s974_s17, %s17_s17   ;;  %s928_s16 = sphi %s972_s16, %s1172_s16   ;;  %s924_s15 = sphi %s970_s15, %s1171_s15   ;;  %s920_s14 = sphi %s968_s14, %s1170_s14   ;;  %s916_s13 = sphi %s966_s13, %s1169_s13   ;;  %s912_s12 = sphi %s964_s12, %s1168_s12  }
   0x6   : > { %p27_p0 = scmp.ge.s32.totalorder %s26_s19, 2  ;;  %s38_s20 = sadd.s32 1, %s920_s14 }
   0x7   : > { %p45_p1 = scmp.ne.s32.totalorder %s920_s14, %s916_s13  ;;  %p46_p2 = scmp.eq.s32.totalorder %s932_s17, 0 }
   0x8   : > { %s1174_s19 = smov (%p27_p0, %s26_s19), 0  ;;  %p51_p4 = scmp.ne.s32.totalorder %s916_s13, %s912_s12 }
   0x9   : > { %p1000_p3 = por %p46_p2, %p45_p1  ;;  %s34_s22 = ssub.s32 %s928_s16, %s1174_s19 }
   0xa   : > { %p52_p5 = scmp.eq.s32.totalorder %s696_s18, 0  ;;  %p36_p6 = scmp.eq.s32.totalorder %s34_s22, 0 }
   0xb   : > { %p758_p8 = scmp.lt.s32.totalorder %s932_s17, 2  ;;  %s149_s25 = sand.u32 1, %s920_s14  }
   0xc   : > { %p1009_p7 = por %p52_p5, %p51_p4  ;;  %s700_s26 = sshll.u32 %s928_s16, 7 }
   0xd   : > { %s1015_s24 = scalar_select %p36_p6, %s920_s14, %s38_s20  }
   0xe   : > { %s699_s27 = sshll.u32 %s149_s25, 6  ;;  %s1022_s30 = scalar_lea.hbm %s1159_s0, %s700_s26 }
   0xf   : > { %s153_s4 = scalar_lea.vmem [#allocation4], %s699_s27  ;;  %p1026_p9 = pnand %p758_p8, %p1000_p3 }
  0x10   : > { %s162_s5 = sshll.u32 %s153_s4, 4  ;;  %s1033_s7 = scalar_lea.sflag [#allocation5], %s149_s25  ;;  %s1030_s5 = int_to_ptr.vmem [resolvable:$true] %s162_s5 }
  0x11   : > { %s822_s8 = scalar_lea.hbm %s1022_s30, 1024  ;;  %p824_p12 = pneg %p1026_p9 }
  0x12   : > { %p823_p11 = scmp.ne.s32.totalorder %s1022_s30, %s822_s8  ;;  %s827_s11 = scalar_lea.hbm %s1159_s0, 2048 }
  0x13   : > { %p828_p1 = scmp.lt.u32.totalorder %s1022_s30, %s1159_s0  ;;  %p829_p2 = scmp.lt.u32.totalorder %s827_s11, %s822_s8 }
  0x14   : > { %p825_p13 = pnand %p824_p12, %p823_p11  ;;  %p831_p4 = scmp.lt.u32.totalorder %s822_s8, %s1022_s30 }
  0x15   : > { %p830_p3 = por %p829_p2, %p828_p1 }
  0x16   : > { %p826_p0 = pneg %p825_p13 }
  0x17   : > { %p832_p5 = por %p831_p4, %p830_p3 }
  0x19   : > { %p833_p6 = pnand %p832_p5, %p826_p0 }
  0x1b   : > { %836 = shalt.err (!%p833_p6)
}
  0x1c   : > { %s837_s21 = scalar_lea.vmem %s1030_s5, 1024  ;;  %s934_s22 = smov [#allocation4]  }
  0x1d   : > { %p838_p8 = scmp.ne.s32.totalorder %s1030_s5, %s837_s21  ;;  %s842_s25 = sshll.u32 %s934_s22, 4  ;;  %s843_s25 = int_to_ptr.vmem [resolvable:$false] %s842_s25 }
  0x1e   : > { %s844_s26 = scalar_lea.vmem %s843_s25, 2048  ;;  %p845_p10 = scmp.lt.s32.totalorder %s1030_s5, %s843_s25 }
  0x1f   : > { %p840_p11 = pnand %p838_p8, %p824_p12  ;;  %p846_p1 = scmp.lt.s32.totalorder %s844_s26, %s837_s21 }
  0x21   : > { %p841_p13 = pneg %p840_p11  ;;  %p847_p2 = por %p846_p1, %p845_p10 }
  0x23   : > { %p848_p3 = pnand %p847_p2, %p841_p13 }
  0x25   : > { %851 = shalt.err (!%p848_p3)
}
  0x26   : > { %s935_s27 = smov 256   ;;  %s936_s28 = smov 128  }
  0x27   : > { %s937_s29 = smov 8   ;;  %p170_p12 = scmp.lt.s32.totalorder %s932_s17, 3 }
  0x28   : > { %757 = dma.hbm_to_vmem [thread:$0]  (!%p1026_p9), %s1022_s30, 1024, %s1030_s5, %s1033_s7, %s935_s27, %s936_s28, %s937_s29  }
  0x29   : > { %p1166_p0 = scmp.ge.s32.totalorder %s932_s17, 1 }
  0x2b   : > { %p171_p4 = pnand %p1166_p0, %p170_p12 }
  0x2c   : > { %s176_s4 = sand.u32 (!%p171_p4), 1, %s916_s13  }
  0x2d   : > { %174 = sbr.rel (%p171_p4) target bundleno = 734 (0x2de), region = 32  ;;  %s702_s8 = sshll.u32 (!%p171_p4), %s176_s4, 6 }
  0x2e   : > { %s177_s9 = scalar_lea.sflag (!%p171_p4), [#allocation5], %s176_s4  ;;  %s1065_s10 = scalar_lea.vmem (!%p171_p4), [#allocation4], %s702_s8 }
  0x34   : > { %903 = dma.done.wait (%p1009_p7), %s177_s9, 1024  }
  0x35   : > { %905 = vsyncadd (%p1009_p7), %s177_s9, 4294966272  ;;  %p703_p10 = scmp.ne.s32.totalorder %s924_s15, 0 }
  0x36   : > { %v938_v0 = vmov (!%p703_p10), 0.0   ;;  %v939_v1 = vmov (!%p703_p10), -inf  }
  0x37   : > { %202 = sbr.rel (%p703_p10) target bundleno = 63 (0x3f), region = 40  ;;  %203 = vst [vmem:[#allocation2] sm:$0xff] (!%p703_p10), %v938_v0  ;;  %204 = vst [vmem:[#allocation2 + $0x8] sm:$0xff] (!%p703_p10), %v938_v0 }
  0x38   : > { %205 = vst [vmem:[#allocation2 + $0x10] sm:$0xff] (!%p703_p10), %v938_v0  ;;  %206 = vst [vmem:[#allocation2 + $0x18] sm:$0xff] (!%p703_p10), %v938_v0 }
  0x39   : > { %207 = vst [vmem:[#allocation2 + $0x20] sm:$0xff] (!%p703_p10), %v938_v0  ;;  %208 = vst [vmem:[#allocation2 + $0x28] sm:$0xff] (!%p703_p10), %v938_v0 }
  0x3a   : > { %209 = vst [vmem:[#allocation2 + $0x30] sm:$0xff] (!%p703_p10), %v938_v0  ;;  %210 = vst [vmem:[#allocation2 + $0x38] sm:$0xff] (!%p703_p10), %v938_v0 }
  0x3b   : > { %211 = vst [vmem:[#allocation3] sm:$0xff] (!%p703_p10), %v939_v1  ;;  %212 = vst [vmem:[#allocation3 + $0x8] sm:$0xff] (!%p703_p10), %v939_v1 }
  0x3c   : > { %213 = vst [vmem:[#allocation3 + $0x10] sm:$0xff] (!%p703_p10), %v939_v1  ;;  %214 = vst [vmem:[#allocation3 + $0x18] sm:$0xff] (!%p703_p10), %v939_v1 }
  0x3d   : > { %215 = vst [vmem:[#allocation3 + $0x20] sm:$0xff] (!%p703_p10), %v939_v1  ;;  %216 = vst [vmem:[#allocation3 + $0x28] sm:$0xff] (!%p703_p10), %v939_v1 }
  0x3e   : > { %217 = vst [vmem:[#allocation3 + $0x30] sm:$0xff] %v939_v1  ;;  %218 = vst [vmem:[#allocation3 + $0x38] sm:$0xff] %v939_v1 }
  0x3f PF: > { %v219_v2 = vld [vmem:[%s1065_s10] sm:$0xff]  ;;  %v220_v4 = vld [vmem:[%s1065_s10 + $0x8] sm:$0xff]  ;;  %v221_v7 = vld [vmem:[%s1065_s10 + $0x10] sm:$0xff]  ;;  %p704_p7 = scmp.ne.s32.totalorder %s924_s15, 1 }
  0x40   : > { %v227_v3 = vld [vmem:[#allocation2] sm:$0xff]  ;;  %v228_v6 = vld [vmem:[#allocation2 + $0x8] sm:$0xff]  ;;  %v229_v8 = vld [vmem:[#allocation2 + $0x10] sm:$0xff]  ;;  %v940_v58 = vmov (!%p704_p7), 0.0   ;;  %vm448_vm0 = vcmask (!%p704_p7), 261120   ;;  %vm941_vm1 = vmmov (!%p704_p7), 0  }
  0x41   : > { %v235_v5 = vadd.f32 %v227_v3, %v219_v2  ;;  %v236_v9 = vadd.f32 %v228_v6, %v220_v4  ;;  %v237_v10 = vadd.f32 %v229_v8, %v221_v7  ;;  %v222_v11 = vld [vmem:[%s1065_s10 + $0x18] sm:$0xff]  ;;  %v223_v13 = vld [vmem:[%s1065_s10 + $0x20] sm:$0xff]  ;;  %v224_v16 = vld [vmem:[%s1065_s10 + $0x28] sm:$0xff]  ;;  %724 = vmatprep.subr.mxu0 (!%p704_p7), %v940_v58  ;;  %726 = vmatprep.mubr.msk.f32.mxu0 (!%p704_p7), %vm941_vm1, %v940_v58  ;;  %vm526_vm2 = vcmask (!%p704_p7), 15360  }
  0x42   : > { %v230_v12 = vld [vmem:[#allocation2 + $0x18] sm:$0xff]  ;;  %v231_v15 = vld [vmem:[#allocation2 + $0x20] sm:$0xff]  ;;  %v232_v17 = vld [vmem:[#allocation2 + $0x28] sm:$0xff]  ;;  %737 = vmatprep.mubr.msk.f32.mxu1 (!%p704_p7), %vm941_vm1, %v940_v58  ;;  %v942_v62 = vmov (!%p704_p7), 0.0|0.0   ;;  %vm354_vm4 = vcmask (!%p704_p7), 130112   ;;  %vm361_vm5 = vcmask (!%p704_p7), 195712  }
  0x43   : > { %243 = vst [vmem:[#allocation2] sm:$0xff] %v235_v5  ;;  %v238_v14 = vadd.f32 %v230_v12, %v222_v11  ;;  %244 = vst [vmem:[#allocation2 + $0x8] sm:$0xff] %v236_v9  ;;  %v239_v18 = vadd.f32 %v231_v15, %v223_v13  ;;  %v240_v19 = vadd.f32 %v232_v17, %v224_v16  ;;  %v225_v20 = vld [vmem:[%s1065_s10 + $0x30] sm:$0xff]  ;;  %v226_v22 = vld [vmem:[%s1065_s10 + $0x38] sm:$0xff]  ;;  %740 = vmatprep.subr.bf16.mxu1 (!%p704_p7), %v942_v62  ;;  %vm368_vm6 = vcmask (!%p704_p7), 261312  }
  0x44   : > { %245 = vst [vmem:[#allocation2 + $0x10] sm:$0xff] %v237_v10  ;;  %v233_v21 = vld [vmem:[#allocation2 + $0x30] sm:$0xff]  ;;  %v234_v24 = vld [vmem:[#allocation2 + $0x38] sm:$0xff]  ;;  %v251_v25 = vld [vmem:[#allocation3] sm:$0xff]  ;;  %vm389_vm7 = vcmask (!%p704_p7), 1041409   ;;  %vm438_vm8 = vcmask (!%p704_p7), 1043459  }
  0x45   : > { %246 = vst [vmem:[#allocation2 + $0x18] sm:$0xff] %v238_v14  ;;  %v241_v23 = vadd.f32 %v233_v21, %v225_v20  ;;  %v252_v26 = vld [vmem:[#allocation3 + $0x8] sm:$0xff]  ;;  %247 = vst [vmem:[#allocation2 + $0x20] sm:$0xff] %v239_v18  ;;  %v242_v27 = vadd.f32 %v234_v24, %v226_v22  ;;  %v259_v28 = vmax.f32 %v251_v25, %v219_v2  ;;  %v253_v30 = vld [vmem:[#allocation3 + $0x10] sm:$0xff]  ;;  %278 = sbr.rel (%p704_p7) target bundleno = 709 (0x2c5), region = 44  ;;  %vm441_vm9 = vcmask (!%p704_p7), 1041408  }
  0x46   : > { %248 = vst [vmem:[#allocation2 + $0x28] sm:$0xff] %v240_v19  ;;  %v260_v29 = vmax.f32 %v252_v26, %v220_v4  ;;  %v254_v31 = vld [vmem:[#allocation3 + $0x18] sm:$0xff]  ;;  %v255_v32 = vld [vmem:[#allocation3 + $0x20] sm:$0xff]  ;;  %v261_v33 = vmax.f32 %v253_v30, %v221_v7  ;;  %v256_v36 = vld [vmem:[#allocation3 + $0x28] sm:$0xff]  ;;  %v343_v7 = vlaneseq (!%p704_p7)  ;;  %vm622_vm10 = vcmask (!%p704_p7), 254976  }
  0x47   : > { %249 = vst [vmem:[#allocation2 + $0x30] sm:$0xff] %v241_v23  ;;  %v262_v34 = vmax.f32 %v254_v31, %v222_v11  ;;  %v263_v35 = vmax.f32 %v255_v32, %v223_v13  ;;  %v257_v37 = vld [vmem:[#allocation3 + $0x30] sm:$0xff]  ;;  %v258_v38 = vld [vmem:[#allocation3 + $0x38] sm:$0xff]  ;;  %250 = vst [vmem:[#allocation2 + $0x38] sm:$0xff] %v242_v27  ;;  %v264_v39 = vmax.f32 %v256_v36, %v224_v16 }
  0x48   : > { %267 = vst [vmem:[#allocation3] sm:$0xff] %v259_v28  ;;  %268 = vst [vmem:[#allocation3 + $0x8] sm:$0xff] %v260_v29  ;;  %v265_v40 = vmax.f32 %v257_v37, %v225_v20  ;;  %v266_v41 = vmax.f32 %v258_v38, %v226_v22  ;;  %v443_v59 = vld [vmem:[%s1160_s1] sm:$0x3] (!%p704_p7)  ;;  %v445_v61 = vld [vmem:[%s1161_s2 + $0x8] sm:$0xff] (!%p704_p7)  ;;  %v344_v10 = vand.u32 (!%p704_p7), 127, %v343_v7 }
  0x49   : > { %269 = vst [vmem:[#allocation3 + $0x10] sm:$0xff] %v261_v33  ;;  %270 = vst [vmem:[#allocation3 + $0x18] sm:$0xff] %v262_v34  ;;  %725 = vmatpush3.xpose.msk.msra.mxu0 (!%p704_p7), %vm448_vm0, %v443_v59  ;;  %v444_v60 = vld [vmem:[%s1161_s2] sm:$0xff] (!%p704_p7)  ;;  %v446_v0 = vld [vmem:[%s1161_s2 + $0x10] sm:$0xff] (!%p704_p7)  ;;  %v346_v13 = vshrl.u32 (!%p704_p7), %v343_v7, 7 }
  0x4a   : > { %271 = vst [vmem:[#allocation3 + $0x20] sm:$0xff] %v263_v35  ;;  %272 = vst [vmem:[#allocation3 + $0x28] sm:$0xff] %v264_v39  ;;  %v279_v43 = vld [vmem:[#allocation2] sm:$0xff] (!%p704_p7)  ;;  %v280_v45 = vld [vmem:[#allocation2 + $0x8] sm:$0xff] (!%p704_p7)  ;;  %v741_v63 = vpack.c.bf16 (!%p704_p7), %v445_v61, %v444_v60  ;;  %v349_v14 = vadd.s32 (!%p704_p7), 4294967288, %v344_v10  ;;  %v356_v15 = vadd.s32 (!%p704_p7), 4294967280, %v344_v10 }
  0x4b   : > { %273 = vst [vmem:[#allocation3 + $0x30] sm:$0xff] %v265_v40  ;;  %274 = vst [vmem:[#allocation3 + $0x38] sm:$0xff] %v266_v41  ;;  %287 = vadd.xlane.f32.xlu0 (!%p704_p7), %v279_v43  ;;  %v281_v47 = vld [vmem:[#allocation2 + $0x10] sm:$0xff] (!%p704_p7)  ;;  %v447_v1 = vld [vmem:[%s1161_s2 + $0x18] sm:$0xff] (!%p704_p7)  ;;  %v363_v16 = vadd.s32 (!%p704_p7), 4294967272, %v344_v10  ;;  %v347_v19 = vsub.s32 (!%p704_p7), %v344_v10, %v346_v13 }
  0x4c   : > { %v283_v42 = vld [vmem:[#allocation2 + $0x20] sm:$0xff]  ;;  %v282_v49 = vld [vmem:[#allocation2 + $0x18] sm:$0xff]  ;;  %vm742_vm3 = vmpackc.low %vm526_vm2, %vm526_vm2  ;;  %v745_v2 = vpack.c.bf16 %v447_v1, %v446_v0  ;;  %v352_v20 = vsub.s32 %v349_v14, %v346_v13  ;;  %v359_v23 = vsub.s32 %v356_v15, %v346_v13 }
  0x4d   : > { %295 = vadd.xlane.f32.xlu1 %v283_v42  ;;  %v284_v44 = vld [vmem:[#allocation2 + $0x28] sm:$0xff]  ;;  %743 = vmatpush3.bf16.xpose.msk.msra.mxu1 %vm742_vm3, %v741_v63  ;;  %v366_v26 = vsub.s32 %v363_v16, %v346_v13 }
  0x4e   : > { %v285_v46 = vld [vmem:[#allocation2 + $0x30] sm:$0xff]  ;;  %v286_v48 = vld [vmem:[#allocation2 + $0x38] sm:$0xff]  ;;  %744 = vmatprep.subr.bf16.mxu1 %v942_v62 }
  0x4f   : > { %289 = vadd.xlane.f32.xlu0 %v280_v45  ;;  %v312_v50 = vld [vmem:[#allocation3 + $0x8] sm:$0xff]  ;;  %v311_v51 = vld [vmem:[#allocation3] sm:$0xff] }
  0x50   : > { %v313_v55 = vld [vmem:[#allocation3 + $0x10] sm:$0xff]  ;;  %v314_v57 = vld [vmem:[#allocation3 + $0x18] sm:$0xff] }
  0x51   : > { %297 = vadd.xlane.f32.xlu1 %v284_v44  ;;  %v316_v52 = vld [vmem:[#allocation3 + $0x28] sm:$0xff]  ;;  %v315_v53 = vld [vmem:[#allocation3 + $0x20] sm:$0xff] }
  0x52   : > { %v317_v54 = vld [vmem:[#allocation3 + $0x30] sm:$0xff]  ;;  %v318_v56 = vld [vmem:[#allocation3 + $0x38] sm:$0xff] }
  0x53   : > { %291 = vadd.xlane.f32.xlu0 %v281_v47 }
  0x55   : > { %299 = vadd.xlane.f32.xlu1 %v285_v46  ;;  %747 = vmatpush3.bf16.xpose.msk.msra.mxu1 %vm742_vm3, %v745_v2 }
  0x57   : > { %293 = vadd.xlane.f32.xlu0 %v282_v49 }
  0x59   : > { %301 = vadd.xlane.f32.xlu1 %v286_v48 }
  0x5b   : > { %319 = vmax.xlane.f32.xlu0 %v311_v51 }
  0x5d   : > { %321 = vmax.xlane.f32.xlu1 %v312_v50 }
  0x5f   : > { %327 = vmax.xlane.f32.xlu0 %v315_v53 }
  0x61   : > { %329 = vmax.xlane.f32.xlu1 %v316_v52 }
  0x63   : > { %323 = vmax.xlane.f32.xlu0 %v313_v55 }
  0x65   : > { %331 = vmax.xlane.f32.xlu1 %v317_v54 }
  0x67   : > { %325 = vmax.xlane.f32.xlu0 %v314_v57 }
  0x69   : > { %333 = vmax.xlane.f32.xlu1 %v318_v56 }
  0xd8   : > { %v288_v4 = vpop.xlane.xlu0 %287 }
  0xd9   : > { %v303_v28 = vmul.f32 0.00390625, %v288_v4 }
  0xda   : > { %v296_v3 = vpop.xlane.xlu1 %295 }
  0xdb   : > { %v307_v27 = vmul.f32 0.00390625, %v296_v3  ;;  %v348_v38 = vrot.slane %v303_v28, %v347_v19 }
  0xdc   : > { %v290_v6 = vpop.xlane.xlu0 %289 }
  0xdd   : > { %v304_v22 = vmul.f32 0.00390625, %v290_v6  ;;  %v373_v37 = vrot.slane %v307_v27, %v347_v19 }
  0xde   : > { %v298_v5 = vpop.xlane.xlu1 %297 }
  0xdf   : > { %v308_v21 = vmul.f32 0.00390625, %v298_v5  ;;  %v353_v34 = vrot.slane %v304_v22, %v352_v20 }
  0xe0   : > { %v292_v9 = vpop.xlane.xlu0 %291 }
  0xe1   : > { %v305_v25 = vmul.f32 0.00390625, %v292_v9  ;;  %v377_v33 = vrot.slane %v308_v21, %v352_v20  ;;  %v355_v48 = vsel %vm354_vm4, %v353_v34, %v348_v38 }
  0xe2   : > { %v300_v8 = vpop.xlane.xlu1 %299 }
  0xe3   : > { %v309_v24 = vmul.f32 0.00390625, %v300_v8  ;;  %v360_v36 = vrot.slane %v305_v25, %v359_v23  ;;  %v378_v47 = vsel %vm354_vm4, %v377_v33, %v373_v37 }
  0xe4   : > { %v294_v12 = vpop.xlane.xlu0 %293 }
  0xe5   : > { %v306_v30 = vmul.f32 0.00390625, %v294_v12  ;;  %v382_v35 = vrot.slane %v309_v24, %v359_v23  ;;  %v362_v52 = vsel %vm361_vm5, %v360_v36, %v355_v48 }
  0xe6   : > { %v302_v11 = vpop.xlane.xlu1 %301 }
  0xe7   : > { %v310_v29 = vmul.f32 0.00390625, %v302_v11  ;;  %v367_v40 = vrot.slane %v306_v30, %v366_v26  ;;  %v383_v51 = vsel %vm361_vm5, %v382_v35, %v378_v47 }
  0xe8   : > { %v320_v18 = vpop.xlane.xlu0 %319 }
  0xe9   : > { %v387_v39 = vrot.slane %v310_v29, %v366_v26  ;;  %v403_v44 = vrot.slane %v320_v18, %v347_v19  ;;  %v369_v54 = vsel %vm368_vm6, %v367_v40, %v362_v52 }
  0xea   : > { %v322_v17 = vpop.xlane.xlu1 %321 }
  0xeb   : > { %v407_v43 = vrot.slane %v322_v17, %v352_v20  ;;  %v388_v53 = vsel %vm368_vm6, %v387_v39, %v383_v51 }
  0xec   : > { %v328_v32 = vpop.xlane.xlu0 %327  ;;  %v390_v1 = vsel %vm389_vm7, %v388_v53, %v369_v54 }
  0xed   : > { %v422_v46 = vrot.slane %v328_v32, %v347_v19  ;;  %v408_v57 = vsel %vm354_vm4, %v407_v43, %v403_v44 }
  0xee   : > { %v330_v31 = vpop.xlane.xlu1 %329 }
  0xef   : > { %v426_v45 = vrot.slane %v330_v31, %v352_v20 }
  0xf0   : > { %v324_v42 = vpop.xlane.xlu0 %323 }
  0xf1   : > { %v412_v50 = vrot.slane %v324_v42, %v359_v23  ;;  %v427_v58 = vsel %vm354_vm4, %v426_v45, %v422_v46 }
  0xf2   : > { %v332_v41 = vpop.xlane.xlu1 %331 }
  0xf3   : > { %v431_v49 = vrot.slane %v332_v41, %v359_v23  ;;  %v413_v62 = vsel %vm361_vm5, %v412_v50, %v408_v57 }
  0xf4   : > { %v326_v56 = vpop.xlane.xlu0 %325 }
  0xf5   : > { %v417_v60 = vrot.slane %v326_v56, %v366_v26  ;;  %v432_v61 = vsel %vm361_vm5, %v431_v49, %v427_v58 }
  0xf6   : > { %v334_v55 = vpop.xlane.xlu1 %333 }
  0xf7   : > { %v436_v59 = vrot.slane %v334_v55, %v366_v26  ;;  %v418_v0 = vsel %vm368_vm6, %v417_v60, %v413_v62 }
  0xf9   : > { %v437_v63 = vsel %vm368_vm6, %v436_v59, %v432_v61 }
  0xfa   : > { %v439_v2 = vsel %vm438_vm8, %v437_v63, %v418_v0 }
  0xfb   : > { %v442_v3 = vsel %vm441_vm9, %v390_v1, %v439_v2 }
  0xfc   : > { %727 = vmatmul.mubr.msk.f32.vlgmr.msra.gmra.mrb[0].mxu0 %vm448_vm0, %v442_v3 }
 0x1cf   : > { %v521_v4 = vpop.f32.mrb[0].mxu0 }
 0x1d0   : > { %v525_v5 = vmax.f32 %v521_v4, 0.0  ;;  %v728_v6 = vpop.f32.mrb[1].mxu0 }
 0x1d2   : > { %738 = vmatmul.mubr.msk.f32.vlgmr.msra.gmra.mrb[0].mxu1 %vm526_vm2, %v525_v5 }
 0x2a5   : > { %v608_v7 = vpop.f32.mrb[0].mxu1 }
 0x2a6   : > { %v613_v8 = vrot.slane %v608_v7, 2  ;;  %v739_v9 = vpop.f32.mrb[1].mxu1 }
 0x2a8   : > { %v615_v10 = vadd.f32 %v613_v8, %v608_v7 }
 0x2aa   : > { %v712_v11 = vmul.f32 -1.442695, %v615_v10 }
 0x2ac   : > { %818 = vpow2.f32 %v712_v11 }
 0x2b6   : > { %v819_v12 = vpop.eup %818 }
 0x2b7   : > { %v619_v13 = vadd.f32 1.0, %v819_v12 }
 0x2b9   : > { %820 = vrcp.f32 %v619_v13 }
 0x2c3   : > { %v821_v14 = vpop.eup %820 }
 0x2c4   : > { %623 = vst.msk [vmem:[#allocation7] sm:$0x3] %vm622_vm10, %v821_v14 }
 0x2c5 PF: > { %p1115_p9 = scmp.eq.s32.totalorder %s696_s18, 1  ;;  %s943_s25 = smov [#allocation7]  }
 0x2c6   : > { %s633_s26 = sshll.u32 %s943_s25, 4  ;;  %s634_s26 = int_to_ptr.vmem [resolvable:$true] %s633_s26 }
 0x2c7   : > { %s852_s27 = scalar_lea.vmem %s634_s26, 32  ;;  %p859_p11 = scmp.lt.s32.totalorder %s634_s26, %s634_s26 }
 0x2c8   : > { %p853_p5 = scmp.ne.s32.totalorder %s634_s26, %s852_s27  ;;  %p860_p13 = scmp.lt.s32.totalorder %s852_s27, %s852_s27 }
 0x2ca   : > { %p854_p6 = pnand %p853_p5, %p1115_p9  ;;  %p861_p1 = por %p860_p13, %p859_p11 }
 0x2cc   : > { %p855_p8 = pneg %p854_p6 }
 0x2ce   : > { %p862_p2 = pnand %p861_p1, %p855_p8 }
 0x2d0   : > { %865 = shalt.err (!%p862_p2)
}
 0x2d1   : > { %s866_s18 = scalar_lea.hbm %s1162_s3, 32 }
 0x2d2   : > { %p867_p3 = scmp.ne.s32.totalorder %s1162_s3, %s866_s18  ;;  %p872_p4 = scmp.lt.u32.totalorder %s866_s18, %s1162_s3 }
 0x2d4   : > { %p868_p12 = pnand %p867_p3, %p1115_p9 }
 0x2d6   : > { %p869_p0 = pneg %p868_p12 }
 0x2d8   : > { %p874_p10 = pnand %p872_p4, %p869_p0 }
 0x2da   : > { %877 = shalt.err (!%p874_p10)
}
 0x2db   : > { %751 = dma.vmem_to_hbm [thread:$0]  (%p1115_p9), %s634_s26, 32, %s1162_s3, [#allocation6]  }
 0x2dc   : > { %907 = dma.done.wait (%p1115_p9), [#allocation6], 32  }
 0x2dd   : > { %909 = vsyncadd (%p1115_p9), [#allocation6], 4294967264 }
 0x2de PF: > { %s17_s17 = sadd.s32 1, %s932_s17   ;;  %s1168_s12 = smov %s916_s13 }
 0x2df   : > { %p14_p7 = scmp.ge.s32.totalorder %s17_s17, 4   ;;  %s1169_s13 = smov %s920_s14 }
 0x2e0   : > { %s1170_s14 = smov %s1015_s24  ;;  %s1171_s15 = smov %s928_s16 }
 0x2e1   : > { %s1172_s16 = smov %s1174_s19  ;;  %16 = sbr.rel (!%p14_p7) target bundleno = 5 (0x5), region = 78 }
 0x2e8   :  { %646 = vsyncpa [#allocation5], 1 }
 0x2e9   :  { %648 = vsyncpa [#allocation5 + $0x1], 1 }
 0x2ea   :  { %649 = vsyncpa [#allocation6], 1 }
 0x2eb   :  { %651 = vsyncpa [#allocation6 + $0x1], 1 }

</bundles_post_ra>
